<compile_context>
chip_gen: v6e
topology: v6e:2x2x1
jax: 0.10.0
libtpu: 0.0.40
codegen_flags: <defaults>
</compile_context>

<pallas_src>
import functools

import jax
import jax.numpy as jnp
from jax import lax
from jax.experimental import pallas as pl
from jax.experimental.pallas import tpu as pltpu


def _multi_cos_loss_kernel(v_ref, t_ref, o_ref, *, mxu_dtype=None):
    """One grid step = p_tile pairs. Writes p_tile per-pair losses."""
    eps_sq = jnp.float32(1e-24)                     # (1e-12)^2, F.normalize clamp

    v = v_ref[...]                                  # [PT, N, D], input dtype
    t = t_ref[...]                                  # [PT, M, D], input dtype
    mm_dtype = v.dtype if mxu_dtype is None else mxu_dtype

    # --- normalize text rows (must happen BEFORE the column max: a per-column
    #     scale would change which column wins) --------------------------------
    t32 = t.astype(jnp.float32)
    t_ss = jnp.sum(t32 * t32, axis=-1, keepdims=True)             # [PT, M, 1]
    inv_t = lax.rsqrt(jnp.maximum(t_ss, eps_sq))                  # 1/max(||t||,eps)
    t_n = (t32 * inv_t).astype(mm_dtype)

    # --- batched raw similarities on the MXU; contraction is on the last (lane)
    #     dim of both operands, so no transpose / XLU pass is needed ------------
    sim = jnp.einsum(
        "pnd,pmd->pnm", v.astype(mm_dtype), t_n,
        preferred_element_type=jnp.float32)                       # [PT, N, M]

    # --- AdaptiveMaxPool1d(1): row max over M. Vision-row normalization is
    #     deferred past the max (positive per-row scale -> argmax unchanged) ----
    row_max = jnp.max(sim, axis=-1)                               # [PT, N]

    v32 = v.astype(jnp.float32)
    v_ss = jnp.sum(v32 * v32, axis=-1)                            # [PT, N]
    inv_v = lax.rsqrt(jnp.maximum(v_ss, eps_sq))                  # 1/max(||v||,eps)
    row_max = row_max * inv_v

    n_rows = row_max.shape[-1]
    pair_loss = jnp.float32(1.0) - jnp.sum(
        row_max, axis=-1, keepdims=True) * jnp.float32(1.0 / n_rows)   # [PT, 1]

    # lane-dense, unmasked store: one loss per sublane row, broadcast over lanes
    o_ref[...] = jnp.broadcast_to(pair_loss, o_ref.shape)


def _squeeze_vision(v):
    """Mimic torch .squeeze(): drop all size-1 dims; require a 2-D result."""
    v = jnp.squeeze(jnp.asarray(v))
    assert v.ndim == 2, f"vision feature must squeeze to 2-D, got {v.shape}"
    return v


def multi_cos_loss(vision_feats, text_feats, *, pair_block=8, mxu_dtype=None):
    """Equivalent of MultiCosLoss.forward as one fused pallas_call.

    `vision_feats`/`text_feats` may be lists of per-pair arrays (stacked here —
    costs one extra HBM round trip) or pre-stacked [P, N, D] / [P, M, D] arrays
    (preferred: no stack copy).  `mxu_dtype=jnp.bfloat16` trades a little
    precision for MXU throughput on f32 inputs.
    """
    if isinstance(vision_feats, (list, tuple)):
        assert len(vision_feats) == len(text_feats)
        v_stack = jnp.stack([_squeeze_vision(v) for v in vision_feats])
        t_stack = jnp.stack([jnp.asarray(t) for t in text_feats])
    else:
        v_stack = jnp.asarray(vision_feats)
        t_stack = jnp.asarray(text_feats)

    P, N, D = v_stack.shape
    Pt, M, Dt = t_stack.shape
    assert P == Pt and D == Dt, (v_stack.shape, t_stack.shape)

    # Block the pair axis.  When blocking is needed, keep p_tile a multiple of 8
    # so the (p_tile, 128) output block stays (8,128)-tile aligned.
    if P <= pair_block:
        p_tile, num_blocks = P, 1
    else:
        p_tile = max(8, (pair_block // 8) * 8)
        num_blocks = pl.cdiv(P, p_tile)
    p_pad = num_blocks * p_tile
    if p_pad != P:
        # zero-padded pairs produce a well-defined finite loss and are sliced off
        v_stack = jnp.pad(v_stack, ((0, p_pad - P), (0, 0), (0, 0)))
        t_stack = jnp.pad(t_stack, ((0, p_pad - P), (0, 0), (0, 0)))

    kernel = functools.partial(_multi_cos_loss_kernel, mxu_dtype=mxu_dtype)

    out = pl.pallas_call(
        kernel,
        out_shape=jax.ShapeDtypeStruct((p_pad, 128), jnp.float32),
        grid=(num_blocks,),
        in_specs=[
            pl.BlockSpec((p_tile, N, D), lambda b: (b, 0, 0)),
            pl.BlockSpec((p_tile, M, D), lambda b: (b, 0, 0)),
        ],
        out_specs=pl.BlockSpec((p_tile, 128), lambda b: (b, 0)),
        compiler_params=pltpu.CompilerParams(
            # pair-blocks are independent -> megacore-parallel on v7x
            dimension_semantics=("parallel",),
            # headroom above the 16/32 MiB scoped default, within v7x physical
            vmem_limit_bytes=48 * 1024 * 1024,
        ),
    )(v_stack, t_stack)

    per_pair = out[:P, 0]                  # one loss per real pair
    return jnp.mean(per_pair)


def _reference(vision_feats, text_feats):
    """Pure-JAX reference (mirrors the PyTorch module) for a sanity check."""
    eps = 1e-12
    total = jnp.float32(0.0)
    for v, t in zip(vision_feats, text_feats):
        v2 = jnp.squeeze(jnp.asarray(v)).astype(jnp.float32)
        t2 = jnp.asarray(t).astype(jnp.float32)
        vn = v2 / jnp.maximum(jnp.linalg.norm(v2, axis=-1, keepdims=True), eps)
        tn = t2 / jnp.maximum(jnp.linalg.norm(t2, axis=-1, keepdims=True), eps)
        sim = vn @ tn.T
        total = total + 1.0 - jnp.mean(jnp.max(sim, axis=-1))
    return total / len(vision_feats)


if __name__ == "__main__":
    key = jax.random.PRNGKey(0)
    N, M, D = 8, 16, 32   # N vision rows, M text rows, D hidden

    def make_pairs(k, num_pairs):
        vs, ts = [], []
        for _ in range(num_pairs):
            k, kv, kt = jax.random.split(k, 3)
            # vision feats carry a squeeze-able singleton dim like the PyTorch code
            vs.append(jax.random.normal(kv, (N, 1, D), dtype=jnp.float32))
            ts.append(jax.random.normal(kt, (M, D), dtype=jnp.float32))
        return k, vs, ts

    # Case 1: few pairs -> single grid step, no padding.
    key, vision_feats, text_feats = make_pairs(key, 3)
    loss = jax.block_until_ready(multi_cos_loss(vision_feats, text_feats))
    ref = jax.block_until_ready(_reference(vision_feats, text_feats))
    assert jnp.allclose(loss, ref, atol=1e-5, rtol=1e-5), (loss, ref)

    # Case 2: more pairs than one block -> padded pair axis, multi-step parallel
    # grid; also exercises the pre-stacked (no jnp.stack) input path.
    key, vision_feats2, text_feats2 = make_pairs(key, 11)
    v_stacked = jnp.stack([jnp.squeeze(v) for v in vision_feats2])
    t_stacked = jnp.stack(text_feats2)
    loss2 = jax.block_until_ready(multi_cos_loss(v_stacked, t_stacked, pair_block=8))
    ref2 = jax.block_until_ready(_reference(vision_feats2, text_feats2))
    assert jnp.allclose(loss2, ref2, atol=1e-5, rtol=1e-5), (loss2, ref2)

    print("KERNEL_OK")
</pallas_src>

<mosaic_0001>
module attributes {stable_mosaic.version = 11 : i64} {
  func.func @_multi_cos_loss_kernel(%arg0: i32, %arg1: memref<3x8x32xf32, #tpu.memory_space<vmem>>, %arg2: memref<3x16x32xf32, #tpu.memory_space<vmem>>, %arg3: memref<3x128xf32, #tpu.memory_space<vmem>>) attributes {dimension_semantics = [#tpu.dimension_semantics<parallel>], iteration_bounds = array<i64: 1>, scalar_prefetch = 0 : i64, scratch_operands = 0 : i64, tpu.core_type = #tpu.core_type<tc>, window_params = [{transform_indices = @transform_0, window_bounds = array<i64: 3, 8, 32>}, {transform_indices = @transform_1, window_bounds = array<i64: 3, 16, 32>}, {transform_indices = @transform_2, window_bounds = array<i64: 3, 128>}]} {
    %c0 = arith.constant 0 : index
    %c0_0 = arith.constant 0 : index
    %c0_1 = arith.constant 0 : index
    %0 = vector.load %arg1[%c0, %c0_0, %c0_1] : memref<3x8x32xf32, #tpu.memory_space<vmem>>, vector<3x8x32xf32>
    %c0_2 = arith.constant 0 : index
    %c0_3 = arith.constant 0 : index
    %c0_4 = arith.constant 0 : index
    %1 = vector.load %arg2[%c0_2, %c0_3, %c0_4] : memref<3x16x32xf32, #tpu.memory_space<vmem>>, vector<3x16x32xf32>
    %2 = arith.mulf %1, %1 : vector<3x16x32xf32>
    %cst = arith.constant dense<0.000000e+00> : vector<3x16xf32>
    %3 = vector.multi_reduction <add>, %2, %cst [2] : vector<3x16x32xf32> to vector<3x16xf32>
    %4 = vector.shape_cast %3 : vector<3x16xf32> to vector<3x16x1xf32>
    %cst_5 = arith.constant 1.000000e-24 : f32
    %5 = vector.broadcast %cst_5 : f32 to vector<3x16x1xf32>
    %6 = arith.maximumf %4, %5 : vector<3x16x1xf32>
    %7 = math.rsqrt %6 : vector<3x16x1xf32>
    %8 = vector.broadcast %7 : vector<3x16x1xf32> to vector<3x16x32xf32>
    %9 = arith.mulf %1, %8 : vector<3x16x32xf32>
    "tpu.trace_start"() <{level = 10 : i32, message = "pnd,pmd->pnm"}> : () -> ()
    %cst_6 = arith.constant dense<0.000000e+00> : vector<3x8x16xf32>
    %10 = tpu.matmul %0, %9, %cst_6 {dimension_numbers = #tpu.dot_dimension_numbers<[2], [2], [1], [1], [0, 0, 0, 1, 1, 1], [0], [0]>} : vector<3x8x32xf32>, vector<3x16x32xf32>, vector<3x8x16xf32> -> vector<3x8x16xf32>
    "tpu.trace_stop"() : () -> ()
    %cst_7 = arith.constant dense<0xFF800000> : vector<3x8xf32>
    %11 = vector.multi_reduction <maximumf>, %10, %cst_7 [2] : vector<3x8x16xf32> to vector<3x8xf32>
    %12 = arith.mulf %0, %0 : vector<3x8x32xf32>
    %cst_8 = arith.constant dense<0.000000e+00> : vector<3x8xf32>
    %13 = vector.multi_reduction <add>, %12, %cst_8 [2] : vector<3x8x32xf32> to vector<3x8xf32>
    %cst_9 = arith.constant 1.000000e-24 : f32
    %14 = vector.broadcast %cst_9 : f32 to vector<3x8xf32>
    %15 = arith.maximumf %13, %14 : vector<3x8xf32>
    %16 = math.rsqrt %15 : vector<3x8xf32>
    %17 = arith.mulf %11, %16 : vector<3x8xf32>
    %cst_10 = arith.constant dense<0.000000e+00> : vector<3xf32>
    %18 = vector.multi_reduction <add>, %17, %cst_10 [1] : vector<3x8xf32> to vector<3xf32>
    %19 = vector.shape_cast %18 : vector<3xf32> to vector<3x1xf32>
    %cst_11 = arith.constant 1.250000e-01 : f32
    %20 = vector.broadcast %cst_11 : f32 to vector<3x1xf32>
    %21 = arith.mulf %19, %20 : vector<3x1xf32>
    %cst_12 = arith.constant 1.000000e+00 : f32
    %22 = vector.broadcast %cst_12 : f32 to vector<3x1xf32>
    %23 = arith.subf %22, %21 : vector<3x1xf32>
    %24 = vector.shape_cast %23 : vector<3x1xf32> to vector<3x1xf32>
    %25 = vector.broadcast %24 : vector<3x1xf32> to vector<3x128xf32>
    %c0_13 = arith.constant 0 : index
    %c0_14 = arith.constant 0 : index
    %26 = vector.load %arg3[%c0_13, %c0_14] : memref<3x128xf32, #tpu.memory_space<vmem>>, vector<3x128xf32>
    tpu.vector_store %arg3[%c0_13, %c0_14], %25 {strides = array<i32>} : memref<3x128xf32, #tpu.memory_space<vmem>>, vector<3x128xf32>,
    return
  }
  func.func @transform_0(%arg0: i32) -> (i32, i32, i32) {
    %c0_i32 = arith.constant 0 : i32
    %c0_i32_0 = arith.constant 0 : i32
    %c0_i32_1 = arith.constant 0 : i32
    return %arg0, %c0_i32, %c0_i32_0 : i32, i32, i32
  }
  func.func @transform_1(%arg0: i32) -> (i32, i32, i32) {
    %c0_i32 = arith.constant 0 : i32
    %c0_i32_0 = arith.constant 0 : i32
    %c0_i32_1 = arith.constant 0 : i32
    return %arg0, %c0_i32, %c0_i32_0 : i32, i32, i32
  }
  func.func @transform_2(%arg0: i32) -> (i32, i32) {
    %c0_i32 = arith.constant 0 : i32
    %c0_i32_0 = arith.constant 0 : i32
    return %arg0, %c0_i32 : i32, i32
  }
}

</mosaic_0001>

<bundles_post_ra>
// kernel: tpu_custom_call.1
= control target key start
LH: loop header
LB: loop body
LE: loop exit
PB: predicated region body
PF: predicated region fallthrough
CT: control target
= control target key end

     0   :  { %7 = vsyncpa [#allocation3], 0  ;;  %s612_s0 = inlined_call_operand.hbm [shape: f32[3,8,32], index: 0, kind: input, shape index: {}]   ;;  %s613_s1 = inlined_call_operand.hbm [shape: f32[3,16,32], index: 1, kind: input, shape index: {}]   ;;  %s614_s2 = inlined_call_operand.hbm [shape: f32[3,128], index: 2, kind: output, shape index: {}]  }
   0x1   :  { %8 = vsyncpa [#allocation6], 0 }
   0x2   :  { %9 = vsyncpa [#allocation4], 0  ;;  %s535_s9 = smov [#allocation2]  }
   0x3   :  { %s15_s10 = sshll.u32 %s535_s9, 4  ;;  %s16_s10 = int_to_ptr.vmem [resolvable:$true] %s15_s10 }
   0x4   :  { %s477_s11 = scalar_lea.vmem %s16_s10, 384  ;;  %p482_p1 = scmp.lt.s32.totalorder %s16_s10, %s16_s10 }
   0x5   :  { %p478_p0 = scmp.ne.s32.totalorder %s16_s10, %s477_s11  ;;  %p483_p2 = scmp.lt.s32.totalorder %s477_s11, %s477_s11 }
   0x7   :  { %p484_p3 = por %p483_p2, %p482_p1 }
   0x9   :  { %p485_p4 = pnand %p484_p3, %p478_p0 }
   0xb   :  { %488 = shalt.err (!%p485_p4)
}
   0xc   :  { %s536_s12 = smov 128   ;;  %s537_s13 = smov 8  }
   0xd   :  { %21 = dma.hbm_to_vmem [thread:$0]  %s612_s0, 384, %s16_s10, [#allocation3], %s536_s12, %s536_s12, %s537_s13  }
   0xe   :  { %s538_s16 = smov [#allocation5]  }
   0xf   :  { %s27_s17 = sshll.u32 %s538_s16, 4  ;;  %s28_s17 = int_to_ptr.vmem [resolvable:$true] %s27_s17 }
  0x10   :  { %s497_s18 = scalar_lea.vmem %s28_s17, 768  ;;  %p502_p6 = scmp.lt.s32.totalorder %s28_s17, %s28_s17 }
  0x11   :  { %p498_p5 = scmp.ne.s32.totalorder %s28_s17, %s497_s18  ;;  %p503_p7 = scmp.lt.s32.totalorder %s497_s18, %s497_s18 }
  0x13   :  { %p504_p8 = por %p503_p7, %p502_p6 }
  0x15   :  { %p505_p9 = pnand %p504_p8, %p498_p5 }
  0x17   :  { %508 = shalt.err (!%p505_p9)
}
  0x18   :  { %33 = dma.hbm_to_vmem [thread:$0]  %s613_s1, 768, %s28_s17, [#allocation6], %s536_s12, %s536_s12, %s537_s13  }
  0x19   :  { %529 = dma.done.wait [#allocation3], 384  }
  0x1a   :  { %530 = vsyncadd [#allocation3], 4294966912 }
  0x1b   :  { %531 = dma.done.wait [#allocation6], 768  }
  0x1c   :  { %532 = vsyncadd [#allocation6], 4294966528  ;;  %v563_v0 = vld [vmem:[#allocation5 + $0x8] sm:$0xff]  ;;  %vm55_vm0 = vcmask 261120   ;;  %v46_v1 = vld [vmem:[#allocation5 + $0x18] sm:$0xff]  ;;  %v539_v18 = vmov 0.0  }
  0x1d   :  { %v565_v2 = vld [vmem:[#allocation5] sm:$0xff]  ;;  %v50_v3 = vmul.f32 %v563_v0, %v563_v0  ;;  %v52_v4 = vmul.f32 %v46_v1, %v46_v1  ;;  %v571_v6 = vld [vmem:[#allocation5 + $0x28] sm:$0xff]  ;;  %v575_v8 = vld [vmem:[#allocation5 + $0x10] sm:$0xff]  ;;  %423 = vmatprep.subr.mxu0 %v539_v18  ;;  %430 = vmatprep.subr.mxu1 %v539_v18  ;;  %vm540_vm1 = vmmov 0   ;;  %vm329_vm2 = vcmask 130048   ;;  %s541_s0 = smov [#allocation7]  }
  0x1e   :  { %v49_v5 = vmul.f32 %v565_v2, %v565_v2  ;;  %v54_v7 = vmul.f32 %v571_v6, %v571_v6  ;;  %v577_v9 = vld [vmem:[#allocation5 + $0x20] sm:$0xff]  ;;  %v51_v14 = vmul.f32 %v575_v8, %v575_v8  ;;  %427 = vmatprep.mubr.msk.f32.mxu0 %vm540_vm1, %v539_v18  ;;  %434 = vmatprep.mubr.msk.f32.mxu1 %vm540_vm1, %v539_v18  ;;  %v40_v19 = vld [vmem:[#allocation2] sm:$0xff]  ;;  %v41_v20 = vld [vmem:[#allocation2 + $0x8] sm:$0xff]  ;;  %vm377_vm3 = vcmask 1041409   ;;  %s395_s1 = sshll.u32 %s541_s0, 4  ;;  %s396_s1 = int_to_ptr.vmem [resolvable:$true] %s395_s1 }
  0x1f   :  { %v59_v10 = vsel %vm55_vm0, %v50_v3, 0.0  ;;  %v65_v11 = vsel %vm55_vm0, %v52_v4, 0.0  ;;  %v53_v15 = vmul.f32 %v577_v9, %v577_v9  ;;  %v42_v21 = vld [vmem:[#allocation2 + $0x10] sm:$0xff]  ;;  %v339_v22 = vmul.f32 %v40_v19, %v40_v19  ;;  %s509_s21 = scalar_lea.vmem %s396_s1, 64  ;;  %p514_p11 = scmp.lt.s32.totalorder %s396_s1, %s396_s1 }
  0x20   :  { %60 = vadd.xlane.f32.xlu0 %v59_v10  ;;  %66 = vadd.xlane.f32.xlu1 %v65_v11  ;;  %v56_v12 = vsel %vm55_vm0, %v49_v5, 0.0  ;;  %v71_v13 = vsel %vm55_vm0, %v54_v7, 0.0  ;;  %v62_v16 = vsel %vm55_vm0, %v51_v14, 0.0  ;;  %v340_v23 = vmul.f32 %v41_v20, %v41_v20  ;;  %p510_p10 = scmp.ne.s32.totalorder %s396_s1, %s509_s21  ;;  %p515_p12 = scmp.lt.s32.totalorder %s509_s21, %s509_s21 }
  0x21   :  { %v68_v17 = vsel %vm55_vm0, %v53_v15, 0.0  ;;  %v341_v24 = vmul.f32 %v42_v21, %v42_v21  ;;  %v342_v25 = vsel %vm55_vm0, %v339_v22, 0.0  ;;  %v363_v3 = vlaneseq }
  0x22   :  { %v345_v26 = vsel %vm55_vm0, %v340_v23, 0.0  ;;  %vm379_vm4 = vcmask 1042434   ;;  %vm382_vm5 = vcmask 59392   ;;  %p516_p13 = por %p515_p12, %p514_p11 }
  0x23   :  { %v348_v27 = vsel %vm55_vm0, %v341_v24, 0.0  ;;  %v364_v5 = vand.u32 127, %v363_v3 }
  0x24   :  { %57 = vadd.xlane.f32.xlu0 %v56_v12  ;;  %72 = vadd.xlane.f32.xlu1 %v71_v13  ;;  %p517_p0 = pnand %p516_p13, %p510_p10 }
  0x28   :  { %63 = vadd.xlane.f32.xlu0 %v62_v16  ;;  %69 = vadd.xlane.f32.xlu1 %v68_v17 }
  0x2c   :  { %343 = vadd.xlane.f32.xlu0 %v342_v25  ;;  %346 = vadd.xlane.f32.xlu1 %v345_v26 }
  0x30   :  { %349 = vadd.xlane.f32.xlu0 %v348_v27 }
  0xa9   :  { %v61_v28 = vpop.xlane.xlu0 %60  ;;  %v67_v29 = vpop.xlane.xlu1 %66 }
  0xaa   :  { %v75_v30 = vmax.f32 %v61_v28, 1e-24  ;;  %v77_v31 = vmax.f32 %v67_v29, 1e-24 }
  0xac   :  { %451 = vrsqrt.f32 %v75_v30 }
  0xad   :  { %453 = vrsqrt.f32 %v77_v31  ;;  %v58_v32 = vpop.xlane.xlu0 %57  ;;  %v73_v33 = vpop.xlane.xlu1 %72 }
  0xae   :  { %v74_v34 = vmax.f32 %v58_v32, 1e-24  ;;  %v79_v35 = vmax.f32 %v73_v33, 1e-24 }
  0xb0   :  { %455 = vrsqrt.f32 %v74_v34 }
  0xb1   :  { %457 = vrsqrt.f32 %v79_v35  ;;  %v64_v36 = vpop.xlane.xlu0 %63  ;;  %v70_v37 = vpop.xlane.xlu1 %69 }
  0xb2   :  { %v76_v38 = vmax.f32 %v64_v36, 1e-24  ;;  %v78_v39 = vmax.f32 %v70_v37, 1e-24 }
  0xb4   :  { %459 = vrsqrt.f32 %v76_v38 }
  0xb5   :  { %461 = vrsqrt.f32 %v78_v39  ;;  %v344_v61 = vpop.xlane.xlu0 %343  ;;  %v347_v62 = vpop.xlane.xlu1 %346 }
  0xb6   :  { %v352_v63 = vmax.f32 %v347_v62, 1e-24 }
  0xb8   :  { %463 = vrsqrt.f32 %v352_v63 }
  0xb9   :  { %v452_v40 = vpop.eup %451 }
  0xba   :  { %v454_v41 = vpop.eup %453  ;;  %v87_v42 = vmul.f32 %v452_v40, %v563_v0  ;;  %v351_v0 = vmax.f32 %v344_v61, 1e-24 }
  0xbb   :  { %v89_v43 = vmul.f32 %v454_v41, %v46_v1  ;;  %v350_v1 = vpop.xlane.xlu0 %349 }
  0xbc   :  { %424 = vmatpush3.xpose.msk.msra.mxu0 %vm55_vm0, %v87_v42  ;;  %465 = vrsqrt.f32 %v351_v0 }
  0xbd   :  { %v456_v44 = vpop.eup %455  ;;  %425 = vmatprep.subr.mxu0 %v539_v18  ;;  %431 = vmatpush3.xpose.msk.msra.mxu1 %vm55_vm0, %v89_v43 }
  0xbe   :  { %v458_v45 = vpop.eup %457  ;;  %v86_v46 = vmul.f32 %v456_v44, %v565_v2  ;;  %432 = vmatprep.subr.mxu1 %v539_v18  ;;  %v353_v2 = vmax.f32 %v350_v1, 1e-24 }
  0xbf   :  { %v91_v47 = vmul.f32 %v458_v45, %v571_v6  ;;  %v366_v6 = vshrl.u32 %v363_v3, 7 }
  0xc0   :  { %426 = vmatpush3.xpose.msk.msra.mxu0 %vm55_vm0, %v86_v46  ;;  %467 = vrsqrt.f32 %v353_v2 }
  0xc1   :  { %v460_v48 = vpop.eup %459  ;;  %437 = vmatprep.subr.mxu0 %v539_v18  ;;  %v367_v12 = vsub.s32 %v364_v5, %v366_v6 }
  0xc2   :  { %v462_v49 = vpop.eup %461  ;;  %v88_v50 = vmul.f32 %v460_v48, %v575_v8 }
  0xc3   :  { %428 = vmatmul.mubr.msk.f32.vlgmr.msra.gmra.mxu0 %vm55_vm0, %v40_v19  ;;  %v90_v51 = vmul.f32 %v462_v49, %v577_v9 }
  0xc4   :  { %433 = vmatpush3.xpose.msk.msra.mxu1 %vm55_vm0, %v88_v50  ;;  %438 = vmatpush3.xpose.msk.msra.mxu0 %vm55_vm0, %v91_v47 }
  0xc5   :  { %439 = vmatprep.subr.mxu0 %v539_v18  ;;  %441 = vmatprep.mubr.msk.f32.mxu0 %vm540_vm1, %v539_v18  ;;  %v464_v4 = vpop.eup %463 }
  0xc7   :  { %435 = vmatmul.mubr.msk.f32.vlgmr.msra.gmra.mxu1 %vm55_vm0, %v41_v20 }
  0xc8   :  { %440 = vmatpush3.xpose.msk.msra.mxu0 %vm55_vm0, %v90_v51 }
  0xc9   :  { %v466_v7 = vpop.eup %465 }
  0xcb   :  { %442 = vmatmul.mubr.msk.f32.vlgmr.msra.gmra.mxu0 %vm55_vm0, %v42_v21 }
  0xcd   :  { %v468_v11 = vpop.eup %467 }
 0x183   :  { %v167_v52 = vpop.f32.mrf.mxu0 }
 0x184   :  { %v330_v53 = vsel %vm329_vm2, %v167_v52, -inf }
 0x185   :  { %v429_v54 = vpop.f32.mrf.mxu0  ;;  %331 = vmax.xlane.f32.xlu1 %v330_v53 }
 0x187   :  { %v246_v55 = vpop.f32.mrf.mxu1 }
 0x188   :  { %v333_v56 = vsel %vm329_vm2, %v246_v55, -inf }
 0x189   :  { %334 = vmax.xlane.f32.xlu0 %v333_v56  ;;  %v436_v57 = vpop.f32.mrf.mxu1 }
 0x18b   :  { %v325_v58 = vpop.f32.mrf.mxu0 }
 0x18c   :  { %v336_v59 = vsel %vm329_vm2, %v325_v58, -inf }
 0x18d   :  { %337 = vmax.xlane.f32.xlu1 %v336_v59  ;;  %v443_v60 = vpop.f32.mrf.mxu0 }
 0x20e   :  { %v332_v8 = vpop.xlane.xlu1 %331 }
 0x20f   :  { %v357_v13 = vmul.f32 %v466_v7, %v332_v8 }
 0x211   :  { %v368_v17 = vrot.slane %v357_v13, %v367_v12 }
 0x212   :  { %v335_v9 = vpop.xlane.xlu0 %334 }
 0x213   :  { %v358_v10 = vmul.f32 %v464_v4, %v335_v9 }
 0x215   :  { %v372_v14 = vrot.slane %v358_v10, %v367_v12 }
 0x216   :  { %v338_v15 = vpop.xlane.xlu1 %337 }
 0x217   :  { %v359_v16 = vmul.f32 %v468_v11, %v338_v15  ;;  %v378_v19 = vsel %vm377_vm3, %v372_v14, %v368_v17 }
 0x219   :  { %v376_v18 = vrot.slane %v359_v16, %v367_v12 }
 0x21b   :  { %v380_v20 = vsel %vm379_vm4, %v376_v18, %v378_v19 }
 0x21c   :  { %v383_v21 = vsel %vm382_vm5, %v380_v20, 0.0 }
 0x21d   :  { %384 = vadd.xlane.f32.xlu0 %v383_v21 }
 0x2a6   :  { %v385_v22 = vpop.xlane.xlu0 %384 }
 0x2a7   :  { %v386_v23 = vmul.f32 0.125, %v385_v22 }
 0x2a9   :  { %v387_v24 = vsub.f32 1.0, %v386_v23 }
 0x2ab   :  { %388 = vst [vmem:[#allocation7] sm:$0x7] %v387_v24 }
 0x2ac   :  { %520 = shalt.err (!%p517_p0)
}
 0x2ad   :  { %398 = dma.vmem_to_hbm [thread:$0]  %s396_s1, 64, %s614_s2, [#allocation4]  }
 0x2ae   :  { %533 = dma.done.wait [#allocation4], 64  }
 0x2af   :  { %534 = vsyncadd [#allocation4], 4294967232 }
 0x2b0   :  { %402 = vsyncpa [#allocation3], 1 }
 0x2b1   :  { %403 = vsyncpa [#allocation6], 1 }
 0x2b2   :  { %404 = vsyncpa [#allocation4], 1 }

</bundles_post_ra>
